<compile_context>
chip_gen: v7x
topology: tpu7x:2x2x1
jax: 0.10.0
libtpu: 0.0.40
codegen_flags: <defaults>
</compile_context>

<pallas_src>
import jax
import jax.numpy as jnp
from jax.experimental import pallas as pl
from jax.experimental.pallas import tpu as pltpu

LANE = 128      # lane width: last-dim padding for hidden/output features
SUB_BF16 = 16   # bf16 packs two rows per sublane -> minimum (16, 128) tile


def _round_up(x, m):
    return (x + m - 1) // m * m


def _nbytes(a):
    return int(a.size) * a.dtype.itemsize


def _vmem_capacity_bytes():
    try:
        return int(pltpu.get_tpu_info().vmem_capacity_bytes)
    except Exception:
        return 64 * 1024 * 1024  # conservative: v7x per-TC VMEM


def mlp_kernel(x_ref, w1_ref, b1_ref, w2_ref, b2_ref, w3_ref, b3_ref, o_ref):
    # Three MXU matmuls (bf16 operands, f32 accumulation) + two ReLUs, fused in VMEM.
    # x arrives as f32 (no wrapper cast pass); cast to bf16 on the VPU.
    x = x_ref[...].astype(w1_ref.dtype)
    h1 = jnp.dot(x, w1_ref[...], preferred_element_type=jnp.float32) + b1_ref[...]
    h1 = jnp.maximum(h1, 0.0).astype(w2_ref.dtype)
    h2 = jnp.dot(h1, w2_ref[...], preferred_element_type=jnp.float32) + b2_ref[...]
    h2 = jnp.maximum(h2, 0.0).astype(w3_ref.dtype)
    out = jnp.dot(h2, w3_ref[...], preferred_element_type=jnp.float32) + b3_ref[...]
    o_ref[...] = out.astype(o_ref.dtype)


def prepare_mlp_params(params, *, compute_dtype=jnp.bfloat16):
    """One-time pad (hidden/output dims -> multiples of 128) + bf16 cast of the weights.

    Zero padding is semantics-preserving: padded hidden columns have zero weights and
    zero bias -> relu(0) = 0; padded w2/w3 rows contribute nothing; padded output
    columns are sliced off in mlp_forward.
    """
    input_dim, hidden_dim = params["w1"].shape
    output_dim = params["w3"].shape[1]
    d_h = _round_up(hidden_dim, LANE)
    d_out = _round_up(output_dim, LANE)

    def pad2(a, rows, cols, dtype):
        return jnp.pad(a, ((0, rows - a.shape[0]), (0, cols - a.shape[1]))).astype(dtype)

    return {
        "w1": pad2(params["w1"], input_dim, d_h, compute_dtype),
        "b1": pad2(params["b1"], 1, d_h, jnp.float32),
        "w2": pad2(params["w2"], d_h, d_h, compute_dtype),
        "b2": pad2(params["b2"], 1, d_h, jnp.float32),
        "w3": pad2(params["w3"], d_h, d_out, compute_dtype),
        "b3": pad2(params["b3"], 1, d_out, jnp.float32),
        "dims": (input_dim, hidden_dim, output_dim),
    }


def mlp_forward(x, prepared, *, tile_b=512, x_buffers=2, out_dtype=jnp.float32):
    """x: [B, input_dim] float32. prepared: output of prepare_mlp_params."""
    B, input_dim = x.shape
    p_in, _, output_dim = prepared["dims"]
    assert input_dim == p_in, "x feature dim does not match prepared params"
    d_h = prepared["w1"].shape[1]
    d_out = prepared["w3"].shape[1]

    x = x.astype(jnp.float32)
    weights = [prepared[k] for k in ("w1", "b1", "w2", "b2", "w3", "b3")]
    resident_bytes = sum(_nbytes(w) for w in weights)

    vmem_cap = _vmem_capacity_bytes()
    budget = (vmem_cap * 3) // 4
    if resident_bytes > budget:
        # TODO(synk): switch to a K/N-tiled accumulator path instead of resident weights.
        raise NotImplementedError(
            f"resident weights ({resident_bytes} B) exceed VMEM budget ({budget} B)")

    out_itemsize = jnp.dtype(out_dtype).itemsize
    # Per-batch-row VMEM bytes: pipelined f32 x tiles + out tiles, plus in-flight
    # intermediates (x bf16 cast, h1/h2 in f32 + bf16, f32 output before cast).
    per_row = (x_buffers * input_dim * 4
               + 2 * d_out * out_itemsize
               + input_dim * 2
               + d_h * (4 + 2) * 2
               + d_out * 4)
    tile_cap = max(SUB_BF16, ((budget - resident_bytes) // per_row) // SUB_BF16 * SUB_BF16)

    # Batch tile: multiple of 16 rows (bf16 sublane packing), clamped to VMEM budget
    # and to the (rounded-up) batch.
    tile_b = max(SUB_BF16, min(_round_up(tile_b, SUB_BF16), tile_cap,
                               _round_up(B, SUB_BF16)))
    Bp = _round_up(B, tile_b)
    grid_b = Bp // tile_b

    xp = x if Bp == B else jnp.pad(x, ((0, Bp - B), (0, 0)))

    # Constant-index (resident) blocks: single-buffer to halve their VMEM cost.
    def resident(shape):
        return pl.BlockSpec(shape, lambda i: (0,) * len(shape),
                            pipeline_mode=pl.Buffered(1))

    flops = 2 * Bp * (input_dim * d_h + d_h * d_h + d_h * d_out)
    bytes_accessed = _nbytes(xp) + resident_bytes + Bp * d_out * out_itemsize
    cost = pl.CostEstimate(flops=flops, transcendentals=0, bytes_accessed=bytes_accessed)

    # Headroom-aware VMEM limit (never the full physical capacity).
    vmem_limit = int(min(vmem_cap * 0.85,
                         max(resident_bytes + tile_b * per_row + (8 << 20), 32 << 20)))

    out = pl.pallas_call(
        mlp_kernel,
        out_shape=jax.ShapeDtypeStruct((Bp, d_out), out_dtype),
        grid_spec=pltpu.PrefetchScalarGridSpec(
            num_scalar_prefetch=0,
            grid=(grid_b,),
            in_specs=[
                # x tile: unpadded contraction dim (full-array-dim exemption), pipelined.
                pl.BlockSpec((tile_b, input_dim), lambda i: (i, 0),
                             pipeline_mode=pl.Buffered(x_buffers)),
                resident((input_dim, d_h)),   # w1
                resident((1, d_h)),           # b1
                resident((d_h, d_h)),         # w2
                resident((1, d_h)),           # b2
                resident((d_h, d_out)),       # w3
                resident((1, d_out)),         # b3
            ],
            out_specs=pl.BlockSpec((tile_b, d_out), lambda i: (i, 0)),
        ),
        compiler_params=pltpu.CompilerParams(
            dimension_semantics=("parallel",),   # batch axis shards across TCs on v7x
            vmem_limit_bytes=vmem_limit,
        ),
        cost_estimate=cost,
    )(xp, *weights)

    return out[:B, :output_dim]


def init_mlp_params(key, input_dim, hidden_dim, output_dim):
    """Deterministic init mirroring nn.Linear default (uniform +/- 1/sqrt(fan_in))."""
    ks = jax.random.split(key, 6)

    def linear(kw, kb, fan_in, fan_out):
        bound = 1.0 / jnp.sqrt(fan_in)
        w = jax.random.uniform(kw, (fan_in, fan_out), jnp.float32, -bound, bound)
        b = jax.random.uniform(kb, (1, fan_out), jnp.float32, -bound, bound)
        return w, b

    w1, b1 = linear(ks[0], ks[1], input_dim, hidden_dim)
    w2, b2 = linear(ks[2], ks[3], hidden_dim, hidden_dim)
    w3, b3 = linear(ks[4], ks[5], hidden_dim, output_dim)
    return {"w1": w1, "b1": b1, "w2": w2, "b2": b2, "w3": w3, "b3": b3}


if __name__ == "__main__":
    input_dim, hidden_dim, output_dim = 16, 32, 8
    batch = 256

    key = jax.random.PRNGKey(0)
    k_x, k_p = jax.random.split(key)
    x = jax.random.normal(k_x, (batch, input_dim), dtype=jnp.float32)
    params = init_mlp_params(k_p, input_dim, hidden_dim, output_dim)

    # Hoisted one-time weight pad + bf16 cast (not in the per-call path).
    prepared = prepare_mlp_params(params)

    # tile_b=128 here so the demo exercises a multi-step pipelined grid at this small
    # batch; the production default is tile_b=512 clamped to the VMEM budget.
    out = mlp_forward(x, prepared, tile_b=128)
    out = jax.block_until_ready(out)
    assert out.shape == (batch, output_dim)

    # Pure-JAX reference using the same bf16-operand / f32-accumulation recipe.
    bf = jnp.bfloat16
    h = jnp.maximum(jnp.dot(x.astype(bf), params["w1"].astype(bf),
                            preferred_element_type=jnp.float32) + params["b1"], 0.0)
    h = jnp.maximum(jnp.dot(h.astype(bf), params["w2"].astype(bf),
                            preferred_element_type=jnp.float32) + params["b2"], 0.0)
    ref = jnp.dot(h.astype(bf), params["w3"].astype(bf),
                  preferred_element_type=jnp.float32) + params["b3"]
    assert jnp.allclose(out, ref, atol=2e-3, rtol=2e-3)

    print("KERNEL_OK")
</pallas_src>

<mosaic_0001>
module attributes {stable_mosaic.version = 11 : i64} {
  func.func @mlp_kernel(%arg0: i32, %arg1: memref<128x16xf32, #tpu.memory_space<vmem>>, %arg2: memref<16x128xbf16, #tpu.memory_space<vmem>>, %arg3: memref<1x128xf32, #tpu.memory_space<vmem>>, %arg4: memref<128x128xbf16, #tpu.memory_space<vmem>>, %arg5: memref<1x128xf32, #tpu.memory_space<vmem>>, %arg6: memref<128x128xbf16, #tpu.memory_space<vmem>>, %arg7: memref<1x128xf32, #tpu.memory_space<vmem>>, %arg8: memref<128x128xf32, #tpu.memory_space<vmem>>) attributes {dimension_semantics = [#tpu.dimension_semantics<parallel>], iteration_bounds = array<i64: 2>, scalar_prefetch = 0 : i64, scratch_operands = 0 : i64, tpu.core_type = #tpu.core_type<tc>, window_params = [{pipeline_mode = #tpu.pipeline_mode<double_buffered>, transform_indices = @transform_0, window_bounds = array<i64: 128, 16>}, {pipeline_mode = #tpu.pipeline_mode<synchronous>, transform_indices = @transform_1, window_bounds = array<i64: 16, 128>}, {pipeline_mode = #tpu.pipeline_mode<synchronous>, transform_indices = @transform_2, window_bounds = array<i64: 1, 128>}, {pipeline_mode = #tpu.pipeline_mode<synchronous>, transform_indices = @transform_3, window_bounds = array<i64: 128, 128>}, {pipeline_mode = #tpu.pipeline_mode<synchronous>, transform_indices = @transform_4, window_bounds = array<i64: 1, 128>}, {pipeline_mode = #tpu.pipeline_mode<synchronous>, transform_indices = @transform_5, window_bounds = array<i64: 128, 128>}, {pipeline_mode = #tpu.pipeline_mode<synchronous>, transform_indices = @transform_6, window_bounds = array<i64: 1, 128>}, {transform_indices = @transform_7, window_bounds = array<i64: 128, 128>}]} {
    %c0 = arith.constant 0 : index
    %c0_0 = arith.constant 0 : index
    %0 = vector.load %arg1[%c0, %c0_0] : memref<128x16xf32, #tpu.memory_space<vmem>>, vector<128x16xf32>
    %1 = arith.truncf %0 : vector<128x16xf32> to vector<128x16xbf16>
    %c0_1 = arith.constant 0 : index
    %c0_2 = arith.constant 0 : index
    %2 = vector.load %arg2[%c0_1, %c0_2] : memref<16x128xbf16, #tpu.memory_space<vmem>>, vector<16x128xbf16>
    %cst = arith.constant dense<0.000000e+00> : vector<128x128xf32>
    %3 = tpu.matmul %1, %2, %cst {dimension_numbers = #tpu.dot_dimension_numbers<[1], [0], [0], [1], [0, 0, 1, 1], [], []>} : vector<128x16xbf16>, vector<16x128xbf16>, vector<128x128xf32> -> vector<128x128xf32>
    %c0_3 = arith.constant 0 : index
    %c0_4 = arith.constant 0 : index
    %4 = vector.load %arg3[%c0_3, %c0_4] : memref<1x128xf32, #tpu.memory_space<vmem>>, vector<1x128xf32>
    %5 = vector.broadcast %4 : vector<1x128xf32> to vector<128x128xf32>
    %6 = arith.addf %3, %5 : vector<128x128xf32>
    %cst_5 = arith.constant 0.000000e+00 : f32
    %7 = vector.broadcast %cst_5 : f32 to vector<128x128xf32>
    %8 = arith.maximumf %6, %7 : vector<128x128xf32>
    %9 = arith.truncf %8 : vector<128x128xf32> to vector<128x128xbf16>
    %c0_6 = arith.constant 0 : index
    %c0_7 = arith.constant 0 : index
    %10 = vector.load %arg4[%c0_6, %c0_7] : memref<128x128xbf16, #tpu.memory_space<vmem>>, vector<128x128xbf16>
    %cst_8 = arith.constant dense<0.000000e+00> : vector<128x128xf32>
    %11 = tpu.matmul %9, %10, %cst_8 {dimension_numbers = #tpu.dot_dimension_numbers<[1], [0], [0], [1], [0, 0, 1, 1], [], []>} : vector<128x128xbf16>, vector<128x128xbf16>, vector<128x128xf32> -> vector<128x128xf32>
    %c0_9 = arith.constant 0 : index
    %c0_10 = arith.constant 0 : index
    %12 = vector.load %arg5[%c0_9, %c0_10] : memref<1x128xf32, #tpu.memory_space<vmem>>, vector<1x128xf32>
    %13 = vector.broadcast %12 : vector<1x128xf32> to vector<128x128xf32>
    %14 = arith.addf %11, %13 : vector<128x128xf32>
    %cst_11 = arith.constant 0.000000e+00 : f32
    %15 = vector.broadcast %cst_11 : f32 to vector<128x128xf32>
    %16 = arith.maximumf %14, %15 : vector<128x128xf32>
    %17 = arith.truncf %16 : vector<128x128xf32> to vector<128x128xbf16>
    %c0_12 = arith.constant 0 : index
    %c0_13 = arith.constant 0 : index
    %18 = vector.load %arg6[%c0_12, %c0_13] : memref<128x128xbf16, #tpu.memory_space<vmem>>, vector<128x128xbf16>
    %cst_14 = arith.constant dense<0.000000e+00> : vector<128x128xf32>
    %19 = tpu.matmul %17, %18, %cst_14 {dimension_numbers = #tpu.dot_dimension_numbers<[1], [0], [0], [1], [0, 0, 1, 1], [], []>} : vector<128x128xbf16>, vector<128x128xbf16>, vector<128x128xf32> -> vector<128x128xf32>
    %c0_15 = arith.constant 0 : index
    %c0_16 = arith.constant 0 : index
    %20 = vector.load %arg7[%c0_15, %c0_16] : memref<1x128xf32, #tpu.memory_space<vmem>>, vector<1x128xf32>
    %21 = vector.broadcast %20 : vector<1x128xf32> to vector<128x128xf32>
    %22 = arith.addf %19, %21 : vector<128x128xf32>
    %c0_17 = arith.constant 0 : index
    %c0_18 = arith.constant 0 : index
    %23 = vector.load %arg8[%c0_17, %c0_18] : memref<128x128xf32, #tpu.memory_space<vmem>>, vector<128x128xf32>
    tpu.vector_store %arg8[%c0_17, %c0_18], %22 {strides = array<i32>} : memref<128x128xf32, #tpu.memory_space<vmem>>, vector<128x128xf32>,
    return
  }
  func.func @transform_0(%arg0: i32) -> (i32, i32) {
    %c0_i32 = arith.constant 0 : i32
    %c0_i32_0 = arith.constant 0 : i32
    return %arg0, %c0_i32 : i32, i32
  }
  func.func @transform_1(%arg0: i32) -> (i32, i32) {
    %c0_i32 = arith.constant 0 : i32
    %c0_i32_0 = arith.constant 0 : i32
    %c0_i32_1 = arith.constant 0 : i32
    return %c0_i32, %c0_i32_0 : i32, i32
  }
  func.func @transform_2(%arg0: i32) -> (i32, i32) {
    %c0_i32 = arith.constant 0 : i32
    %c0_i32_0 = arith.constant 0 : i32
    %c0_i32_1 = arith.constant 0 : i32
    return %c0_i32, %c0_i32_0 : i32, i32
  }
  func.func @transform_3(%arg0: i32) -> (i32, i32) {
    %c0_i32 = arith.constant 0 : i32
    %c0_i32_0 = arith.constant 0 : i32
    %c0_i32_1 = arith.constant 0 : i32
    return %c0_i32, %c0_i32_0 : i32, i32
  }
  func.func @transform_4(%arg0: i32) -> (i32, i32) {
    %c0_i32 = arith.constant 0 : i32
    %c0_i32_0 = arith.constant 0 : i32
    %c0_i32_1 = arith.constant 0 : i32
    return %c0_i32, %c0_i32_0 : i32, i32
  }
  func.func @transform_5(%arg0: i32) -> (i32, i32) {
    %c0_i32 = arith.constant 0 : i32
    %c0_i32_0 = arith.constant 0 : i32
    %c0_i32_1 = arith.constant 0 : i32
    return %c0_i32, %c0_i32_0 : i32, i32
  }
  func.func @transform_6(%arg0: i32) -> (i32, i32) {
    %c0_i32 = arith.constant 0 : i32
    %c0_i32_0 = arith.constant 0 : i32
    %c0_i32_1 = arith.constant 0 : i32
    return %c0_i32, %c0_i32_0 : i32, i32
  }
  func.func @transform_7(%arg0: i32) -> (i32, i32) {
    %c0_i32 = arith.constant 0 : i32
    %c0_i32_0 = arith.constant 0 : i32
    return %arg0, %c0_i32 : i32, i32
  }
}

</mosaic_0001>

<bundles_post_ra>
// kernel: tpu_custom_call.1
= control target key start
LH: loop header
LB: loop body
LE: loop exit
PB: predicated region body
PF: predicated region fallthrough
CT: control target
= control target key end

     0   :  { %12 = vsyncpa [#allocation3], 0  ;;  %s1458_s0 = inlined_call_operand.vmem [shape: f32[256,16], index: 0, kind: input, shape index: {}]   ;;  %s1459_s1 = inlined_call_operand.vmem [shape: bf16[16,128], index: 1, kind: input, shape index: {}]   ;;  %s1460_s2 = inlined_call_operand.vmem [shape: f32[1,128], index: 2, kind: input, shape index: {}]   ;;  %s1461_s3 = inlined_call_operand.vmem [shape: bf16[128,128], index: 3, kind: input, shape index: {}]   ;;  %s1462_s4 = inlined_call_operand.vmem [shape: f32[1,128], index: 4, kind: input, shape index: {}]   ;;  %s1463_s5 = inlined_call_operand.vmem [shape: bf16[128,128], index: 5, kind: input, shape index: {}]   ;;  %s1464_s6 = inlined_call_operand.vmem [shape: f32[1,128], index: 6, kind: input, shape index: {}]   ;;  %s1465_s7 = inlined_call_operand.hbm [shape: f32[256,128], index: 7, kind: output, shape index: {}]  }
   0x1   :  { %14 = vsyncpa [#allocation3 + $0x1], 0  ;;  %s1247_s24 = smov 0   ;;  %s1249_s25 = smov 0  }
   0x2   :  { %s1251_s26 = smov 0   ;;  %s1253_s27 = smov 0  }
   0x3 LB: > { %s1268_s28 = sadd.s32 4294967295, %s1202_s27   ;;  %s918_s29 = sadd.s32 4294967294, %s1202_s27   ;;  %s1202_s27 = sphi %s1253_s27, %s1471_s27   ;;  %s1198_s26 = sphi %s1251_s26, %s1470_s26   ;;  %s1194_s25 = sphi %s1249_s25, %s1469_s25   ;;  %s1190_s24 = sphi %s1247_s24, %s1468_s24  }
   0x4   : > { %s1272_s30 = sadd.s32 1, %s1202_s27   ;;  %s179_s8 = sadd.s32 1, %s1198_s26 }
   0x5   : > { %s176_s9 = ssub.s32 %s1202_s27, %s1272_s30  ;;  %p189_p0 = scmp.ne.s32.totalorder %s1198_s26, %s1194_s25 }
   0x6   : > { %p177_p1 = scmp.eq.s32.totalorder %s176_s9, 0  ;;  %p190_p2 = scmp.eq.s32.totalorder %s1268_s28, 1 }
   0x7   : > { %p195_p3 = scmp.ne.s32.totalorder %s1194_s25, %s1190_s24  ;;  %p196_p4 = scmp.eq.s32.totalorder %s918_s29, 1 }
   0x8   : > { %s1283_s10 = scalar_select %p177_p1, %s1198_s26, %s179_s8  }
   0x9   : > { %p1285_p5 = por %p190_p2, %p189_p0  ;;  %p1289_p6 = por %p196_p4, %p195_p3 }
   0xa   : > { %p921_p7 = scmp.ge.s32.totalorder %s1202_s27, 1  ;;  %p241_p8 = scmp.lt.s32.totalorder %s1202_s27, 3 }
   0xc   : > { %p242_p9 = pnand %p921_p7, %p241_p8 }
   0xd   : > { %v1123_v0 = vld [vmem:[%s1459_s1] sm:$0xff] (!%p242_p9)   ;;  %s923_s15 = sshll.u32 (!%p242_p9), %s1268_s28, 4  ;;  %v1125_v2 = vld [vmem:[%s1461_s3 + $0x8] sm:$0xff] (!%p242_p9)   ;;  %v1126_v3 = vld [vmem:[%s1461_s3 + $0x10] sm:$0xff] (!%p242_p9)   ;;  %vm320_vm0 = vcmask (!%p242_p9), 130048   ;;  %s270_s14 = sand.u32 (!%p242_p9), 1, %s1194_s25  }
   0xe   : > { %245 = sbr.rel (%p242_p9) target bundleno = 728 (0x2d8), region = 48  ;;  %p274_p10 = scmp.lt.s32.totalorder (!%p242_p9), %s923_s15, 31  ;;  %1000 = vmatprep.subr.bf16.mxu0 (!%p242_p9), %v1123_v0  ;;  %v1124_v1 = vld [vmem:[%s1461_s3] sm:$0xff] (!%p242_p9)   ;;  %v1127_v13 = vld [vmem:[%s1461_s3 + $0x18] sm:$0xff] (!%p242_p9)   ;;  %v1129_v21 = vld [vmem:[%s1461_s3 + $0x28] sm:$0xff] (!%p242_p9)  }
   0xf   : > { %1001 = vmatpush3.bf16.msra.mxu0 (!%p242_p9), %v1123_v0  ;;  %1018 = vmatprep.subr.bf16.mxu1 (!%p242_p9), %v1124_v1  ;;  %v1128_v18 = vld [vmem:[%s1461_s3 + $0x20] sm:$0xff] (!%p242_p9)   ;;  %v1130_v31 = vld [vmem:[%s1461_s3 + $0x30] sm:$0xff] (!%p242_p9)   ;;  %v1131_v32 = vld [vmem:[%s1461_s3 + $0x38] sm:$0xff] (!%p242_p9)   ;;  %s958_s19 = sshll.u32 (!%p242_p9), %s1268_s28, 11  ;;  %s1417_s28 = scalar_lea.sflag (!%p242_p9), [#allocation3], %s270_s14 }
  0x10   : > { %1019 = vmatpush3.bf16.msra.mxu1 (!%p242_p9), %v1124_v1  ;;  %v1132_v33 = vld [vmem:[%s1463_s5] sm:$0xff] (!%p242_p9)   ;;  %v1133_v34 = vld [vmem:[%s1463_s5 + $0x8] sm:$0xff] (!%p242_p9)   ;;  %v1134_v35 = vld [vmem:[%s1463_s5 + $0x10] sm:$0xff] (!%p242_p9)   ;;  %s1408_s29 = scalar_lea.hbm (!%p242_p9), %s1465_s7, %s958_s19  ;;  %s1204_s8 = smov (!%p242_p9), [#allocation2]  }
  0x11   : > { %1020 = vmatprep.subr.bf16.mxu1 (!%p242_p9), %v1125_v2  ;;  %1050 = vmatprep.subr.bf16.mxu0 (!%p242_p9), %v1132_v33  ;;  %v1135_v36 = vld [vmem:[%s1463_s5 + $0x18] sm:$0xff] (!%p242_p9)   ;;  %v1136_v37 = vld [vmem:[%s1463_s5 + $0x20] sm:$0xff] (!%p242_p9)   ;;  %v1137_v38 = vld [vmem:[%s1463_s5 + $0x28] sm:$0xff] (!%p242_p9)   ;;  %s1144_s9 = sshll.u32 (!%p242_p9), %s1204_s8, 4  ;;  %s1145_s9 = int_to_ptr.vmem [resolvable:$false] %s1144_s9 }
  0x12   : > { %v925_v39 = vld [vmem:[%s1460_s2] ss:$0 sm:$0xff] (!%p242_p9)  ;;  %s1146_s13 = scalar_lea.vmem (!%p242_p9), %s1145_s9, 4096 }
  0x14   : > { %1021 = vmatpush3.bf16.msra.mxu1 (!%p242_p9), %v1125_v2 }
  0x15   : > { %s1473_s15 = smov (!%p274_p10, %s923_s15), 31  ;;  %1022 = vmatprep.subr.bf16.mxu1 %v1126_v3 }
  0x16   : > { %s924_s20 = sshll.u32 %s1473_s15, 3  ;;  %s922_s15 = sshll.u32 %s270_s14, 7 }
  0x17   : > { %s1308_s23 = scalar_lea.vmem %s1458_s0, %s924_s20  ;;  %s1388_s18 = scalar_lea.vmem [#allocation2], %s922_s15 }
  0x18   : > { %v281_v4 = vld [vmem:[%s1308_s23] sm:$0xff]  ;;  %v282_v5 = vld [vmem:[%s1308_s23 + $0x8] sm:$0xff]  ;;  %v283_v6 = vld [vmem:[%s1308_s23 + $0x10] sm:$0xff]  ;;  %1023 = vmatpush3.bf16.msra.mxu1 %v1126_v3  ;;  %s856_s20 = sshll.u32 %s1388_s18, 4  ;;  %s1410_s20 = int_to_ptr.vmem [resolvable:$true] %s856_s20 }
  0x19   : > { %v297_v7 = vpack.c.bf16 %v282_v5, %v281_v4  ;;  %v284_v8 = vld [vmem:[%s1308_s23 + $0x18] sm:$0xff]  ;;  %v285_v9 = vld [vmem:[%s1308_s23 + $0x20] sm:$0xff]  ;;  %v286_v10 = vld [vmem:[%s1308_s23 + $0x28] sm:$0xff]  ;;  %1024 = vmatprep.subr.bf16.mxu1 %v1127_v13  ;;  %p1147_p0 = scmp.lt.s32.totalorder %s1410_s20, %s1145_s9 }
  0x1a   : > { %v298_v11 = vpack.c.bf16 %v284_v8, %v283_v6  ;;  %v299_v12 = vpack.c.bf16 %v286_v10, %v285_v9  ;;  %v287_v14 = vld [vmem:[%s1308_s23 + $0x30] sm:$0xff]  ;;  %v288_v15 = vld [vmem:[%s1308_s23 + $0x38] sm:$0xff]  ;;  %v289_v16 = vld [vmem:[%s1308_s23 + $0x40] sm:$0xff] }
  0x1b   : > { %1002 = vmatprep.mubr.msk.bf16.mxu0 %vm320_vm0, %v297_v7  ;;  %v290_v17 = vld [vmem:[%s1308_s23 + $0x48] sm:$0xff]  ;;  %v300_v19 = vpack.c.bf16 %v288_v15, %v287_v14  ;;  %v291_v22 = vld [vmem:[%s1308_s23 + $0x50] sm:$0xff]  ;;  %v292_v23 = vld [vmem:[%s1308_s23 + $0x58] sm:$0xff] }
  0x1c   : > { %1003 = vmatmul.mubr.msk.bf16.vlgmr.msra.gmra.mrb[0].mxu0 %vm320_vm0, %v298_v11  ;;  %v301_v20 = vpack.c.bf16 %v290_v17, %v289_v16  ;;  %1025 = vmatpush3.bf16.msra.mxu1 %v1127_v13  ;;  %v293_v24 = vld [vmem:[%s1308_s23 + $0x60] sm:$0xff]  ;;  %v294_v25 = vld [vmem:[%s1308_s23 + $0x68] sm:$0xff]  ;;  %v302_v26 = vpack.c.bf16 %v292_v23, %v291_v22  ;;  %v295_v28 = vld [vmem:[%s1308_s23 + $0x70] sm:$0xff] }
  0x1d   : > { %1006 = vmatprep.mubr.msk.bf16.mxu0 %vm320_vm0, %v299_v12  ;;  %1026 = vmatprep.subr.bf16.mxu1 %v1128_v18  ;;  %v303_v27 = vpack.c.bf16 %v294_v25, %v293_v24  ;;  %v296_v29 = vld [vmem:[%s1308_s23 + $0x78] sm:$0xff]  ;;  %s1140_s23 = scalar_lea.vmem %s1410_s20, 2048 }
  0x1e   : > { %v304_v30 = vpack.c.bf16 %v296_v29, %v295_v28  ;;  %1051 = vmatpush3.bf16.msra.mxu0 %v1132_v33  ;;  %v1139_v33 = vld [vmem:[%s1463_s5 + $0x38] sm:$0xff]   ;;  %p1141_p11 = scmp.ne.s32.totalorder %s1410_s20, %s1140_s23  ;;  %p1148_p1 = scmp.lt.s32.totalorder %s1146_s13, %s1140_s23 }
  0x1f   : > { %1052 = vmatprep.subr.bf16.mxu0 %v1133_v34 }
  0x20   : > { %1027 = vmatpush3.bf16.msra.mxu1 %v1128_v18  ;;  %p1142_p12 = pnand %p1141_p11, %p1285_p5  ;;  %p1149_p2 = por %p1148_p1, %p1147_p0 }
  0x21   : > { %1028 = vmatprep.subr.bf16.mxu1 %v1129_v21 }
  0x22   : > { %1053 = vmatpush3.bf16.msra.mxu0 %v1133_v34  ;;  %v935_v34 = vld [vmem:[%s1462_s4] ss:$0 sm:$0xff]  ;;  %p1143_p13 = pneg %p1142_p12 }
  0x23   : > { %1054 = vmatprep.subr.bf16.mxu0 %v1134_v35 }
  0x24   : > { %1007 = vmatmul.mubr.msk.bf16.gmra.mrb[4].mxu0 %vm320_vm0, %v300_v19  ;;  %1029 = vmatpush3.bf16.msra.mxu1 %v1129_v21  ;;  %p1150_p3 = pnand %p1149_p2, %p1143_p13 }
  0x25   : > { %1010 = vmatprep.mubr.msk.bf16.mxu0 %vm320_vm0, %v301_v20  ;;  %1030 = vmatprep.subr.bf16.mxu1 %v1130_v31 }
  0x26   : > { %1055 = vmatpush3.bf16.msra.mxu0 %v1134_v35 }
  0x27   : > { %1056 = vmatprep.subr.bf16.mxu0 %v1135_v36 }
  0x28   : > { %1031 = vmatpush3.bf16.msra.mxu1 %v1130_v31 }
  0x29   : > { %1032 = vmatprep.subr.bf16.mxu1 %v1131_v32 }
  0x2a   : > { %1057 = vmatpush3.bf16.msra.mxu0 %v1135_v36 }
  0x2b   : > { %1058 = vmatprep.subr.bf16.mxu0 %v1136_v37 }
  0x2c   : > { %1011 = vmatmul.mubr.msk.bf16.gmra.mrb[8].mxu0 %vm320_vm0, %v302_v26  ;;  %1033 = vmatpush3.bf16.msra.mxu1 %v1131_v32  ;;  %v1138_v32 = vld [vmem:[%s1463_s5 + $0x30] sm:$0xff]  }
  0x2d   : > { %1014 = vmatprep.mubr.msk.bf16.mxu0 %vm320_vm0, %v303_v27 }
  0x2e   : > { %1059 = vmatpush3.bf16.msra.mxu0 %v1136_v37 }
  0x2f   : > { %1060 = vmatprep.subr.bf16.mxu0 %v1137_v38 }
  0x32   : > { %1061 = vmatpush3.bf16.msra.mxu0 %v1137_v38 }
  0x33   : > { %1062 = vmatprep.subr.bf16.mxu0 %v1138_v32 }
  0x34   : > { %1015 = vmatmul.mubr.msk.bf16.gmra.mrb[12].mxu0 %vm320_vm0, %v304_v30 }
  0x36   : > { %1063 = vmatpush3.bf16.msra.mxu0 %v1138_v32 }
  0x37   : > { %1064 = vmatprep.subr.bf16.mxu0 %v1139_v33 }
  0x3a   : > { %1065 = vmatpush3.bf16.msra.mxu0 %v1139_v33 }
  0xef   : > { %v1004_v40 = vpop.f32.mrb[0].mxu0 }
  0xf0   : > { %v388_v41 = vadd.f32 %v1004_v40, %v925_v39  ;;  %v379_v42 = vpop.f32.mrb[1].mxu0 }
  0xf1   : > { %v380_v43 = vadd.f32 %v925_v39, %v379_v42  ;;  %v1005_v44 = vpop.f32.mrb[2].mxu0 }
  0xf2   : > { %v391_v45 = vadd.f32 %v1005_v44, %v925_v39  ;;  %v382_v46 = vpop.f32.mrb[3].mxu0  ;;  %v444_v48 = vmax.f32 %v388_v41, 0.0 }
  0xf3   : > { %v383_v47 = vadd.f32 %v925_v39, %v382_v46  ;;  %v442_v50 = vmax.f32 %v380_v43, 0.0 }
  0xf4   : > { %v445_v49 = vmax.f32 %v391_v45, 0.0 }
  0xf5   : > { %v443_v51 = vmax.f32 %v383_v47, 0.0 }
  0xf6   : > { %v459_v52 = vpack.c.bf16 %v445_v49, %v444_v48 }
  0xf7   : > { %v1008_v53 = vpop.f32.mrb[4].mxu0  ;;  %v458_v54 = vpack.c.bf16 %v443_v51, %v442_v50 }
  0xf8   : > { %v404_v55 = vadd.f32 %v1008_v53, %v925_v39  ;;  %v395_v56 = vpop.f32.mrb[5].mxu0 }
  0xf9   : > { %v396_v57 = vadd.f32 %v925_v39, %v395_v56  ;;  %v1009_v58 = vpop.f32.mrb[6].mxu0  ;;  %1034 = vmatprep.mubr.bf16.mxu1 %v458_v54 }
  0xfa   : > { %v407_v59 = vadd.f32 %v1009_v58, %v925_v39  ;;  %v398_v60 = vpop.f32.mrb[7].mxu0  ;;  %1035 = vmatmul.mubr.bf16.vlgmr.msra.gmra.mrb[0].mxu1 %v459_v52  ;;  %v448_v62 = vmax.f32 %v404_v55, 0.0 }
  0xfb   : > { %v399_v61 = vadd.f32 %v925_v39, %v398_v60  ;;  %v446_v0 = vmax.f32 %v396_v57, 0.0 }
  0xfc   : > { %v449_v63 = vmax.f32 %v407_v59, 0.0 }
  0xfd   : > { %v447_v1 = vmax.f32 %v399_v61, 0.0 }
  0xfe   : > { %v461_v2 = vpack.c.bf16 %v449_v63, %v448_v62 }
  0xff   : > { %v460_v3 = vpack.c.bf16 %v447_v1, %v446_v0  ;;  %v1012_v4 = vpop.f32.mrb[8].mxu0 }
 0x100   : > { %v420_v5 = vadd.f32 %v1012_v4, %v925_v39  ;;  %v411_v6 = vpop.f32.mrb[9].mxu0 }
 0x101   : > { %v412_v7 = vadd.f32 %v925_v39, %v411_v6  ;;  %v1013_v8 = vpop.f32.mrb[10].mxu0  ;;  %1038 = vmatprep.mubr.bf16.mxu1 %v460_v3 }
 0x102   : > { %v423_v9 = vadd.f32 %v1013_v8, %v925_v39  ;;  %v414_v10 = vpop.f32.mrb[11].mxu0  ;;  %1039 = vmatmul.mubr.bf16.gmra.mrb[4].mxu1 %v461_v2  ;;  %v452_v12 = vmax.f32 %v420_v5, 0.0 }
 0x103   : > { %v415_v11 = vadd.f32 %v925_v39, %v414_v10  ;;  %v450_v14 = vmax.f32 %v412_v7, 0.0 }
 0x104   : > { %v453_v13 = vmax.f32 %v423_v9, 0.0 }
 0x105   : > { %v451_v15 = vmax.f32 %v415_v11, 0.0 }
 0x106   : > { %v463_v16 = vpack.c.bf16 %v453_v13, %v452_v12 }
 0x107   : > { %v462_v17 = vpack.c.bf16 %v451_v15, %v450_v14  ;;  %v1016_v18 = vpop.f32.mrb[12].mxu0 }
 0x108   : > { %v436_v19 = vadd.f32 %v1016_v18, %v925_v39  ;;  %v427_v20 = vpop.f32.mrb[13].mxu0 }
 0x109   : > { %v428_v21 = vadd.f32 %v925_v39, %v427_v20  ;;  %v1017_v22 = vpop.f32.mrb[14].mxu0  ;;  %1042 = vmatprep.mubr.bf16.mxu1 %v462_v17 }
 0x10a   : > { %v439_v23 = vadd.f32 %v1017_v22, %v925_v39  ;;  %v430_v24 = vpop.f32.mrb[15].mxu0  ;;  %1043 = vmatmul.mubr.bf16.gmra.mrb[8].mxu1 %v463_v16  ;;  %v456_v26 = vmax.f32 %v436_v19, 0.0 }
 0x10b   : > { %v431_v25 = vadd.f32 %v925_v39, %v430_v24  ;;  %v454_v28 = vmax.f32 %v428_v21, 0.0 }
 0x10c   : > { %v457_v27 = vmax.f32 %v439_v23, 0.0 }
 0x10d   : > { %v455_v29 = vmax.f32 %v431_v25, 0.0 }
 0x10e   : > { %v465_v30 = vpack.c.bf16 %v457_v27, %v456_v26  ;;  %v944_v27 = vld [vmem:[%s1464_s6] ss:$0 sm:$0xff] }
 0x10f   : > { %v464_v31 = vpack.c.bf16 %v455_v29, %v454_v28 }
 0x111   : > { %1046 = vmatprep.mubr.bf16.mxu1 %v464_v31 }
 0x112   : > { %1047 = vmatmul.mubr.bf16.gmra.mrb[12].mxu1 %v465_v30 }
 0x1cd   : > { %v1036_v35 = vpop.f32.mrb[0].mxu1 }
 0x1ce   : > { %v580_v36 = vadd.f32 %v1036_v35, %v935_v34  ;;  %v571_v37 = vpop.f32.mrb[1].mxu1 }
 0x1cf   : > { %v572_v38 = vadd.f32 %v935_v34, %v571_v37  ;;  %v1037_v39 = vpop.f32.mrb[2].mxu1 }
 0x1d0   : > { %v583_v40 = vadd.f32 %v1037_v39, %v935_v34  ;;  %v574_v41 = vpop.f32.mrb[3].mxu1  ;;  %v636_v43 = vmax.f32 %v580_v36, 0.0 }
 0x1d1   : > { %v575_v42 = vadd.f32 %v935_v34, %v574_v41  ;;  %v634_v45 = vmax.f32 %v572_v38, 0.0 }
 0x1d2   : > { %v637_v44 = vmax.f32 %v583_v40, 0.0 }
 0x1d3   : > { %v635_v46 = vmax.f32 %v575_v42, 0.0 }
 0x1d4   : > { %v651_v47 = vpack.c.bf16 %v637_v44, %v636_v43 }
 0x1d5   : > { %v650_v48 = vpack.c.bf16 %v635_v46, %v634_v45  ;;  %v1040_v49 = vpop.f32.mrb[4].mxu1 }
 0x1d6   : > { %v596_v50 = vadd.f32 %v1040_v49, %v935_v34  ;;  %v587_v51 = vpop.f32.mrb[5].mxu1 }
 0x1d7   : > { %v588_v52 = vadd.f32 %v935_v34, %v587_v51  ;;  %v1041_v53 = vpop.f32.mrb[6].mxu1  ;;  %1066 = vmatprep.mubr.bf16.mxu0 %v650_v48 }
 0x1d8   : > { %v599_v54 = vadd.f32 %v1041_v53, %v935_v34  ;;  %v590_v55 = vpop.f32.mrb[7].mxu1  ;;  %1067 = vmatmul.mubr.bf16.vlgmr.msra.gmra.mrb[16].mxu0 %v651_v47  ;;  %v640_v57 = vmax.f32 %v596_v50, 0.0 }
 0x1d9   : > { %v591_v56 = vadd.f32 %v935_v34, %v590_v55  ;;  %v638_v59 = vmax.f32 %v588_v52, 0.0 }
 0x1da   : > { %v641_v58 = vmax.f32 %v599_v54, 0.0 }
 0x1db   : > { %v639_v60 = vmax.f32 %v591_v56, 0.0 }
 0x1dc   : > { %v653_v61 = vpack.c.bf16 %v641_v58, %v640_v57 }
 0x1dd   : > { %v652_v62 = vpack.c.bf16 %v639_v60, %v638_v59  ;;  %v1044_v63 = vpop.f32.mrb[8].mxu1 }
 0x1de   : > { %v612_v0 = vadd.f32 %v1044_v63, %v935_v34  ;;  %v603_v1 = vpop.f32.mrb[9].mxu1 }
 0x1df   : > { %v604_v2 = vadd.f32 %v935_v34, %v603_v1  ;;  %v1045_v3 = vpop.f32.mrb[10].mxu1  ;;  %1070 = vmatprep.mubr.bf16.mxu0 %v652_v62 }
 0x1e0   : > { %v615_v4 = vadd.f32 %v1045_v3, %v935_v34  ;;  %v606_v5 = vpop.f32.mrb[11].mxu1  ;;  %1071 = vmatmul.mubr.bf16.gmra.mrb[20].mxu0 %v653_v61  ;;  %v644_v7 = vmax.f32 %v612_v0, 0.0 }
 0x1e1   : > { %v607_v6 = vadd.f32 %v935_v34, %v606_v5  ;;  %v642_v9 = vmax.f32 %v604_v2, 0.0 }
 0x1e2   : > { %v645_v8 = vmax.f32 %v615_v4, 0.0 }
 0x1e3   : > { %v643_v10 = vmax.f32 %v607_v6, 0.0 }
 0x1e4   : > { %v655_v11 = vpack.c.bf16 %v645_v8, %v644_v7 }
 0x1e5   : > { %v654_v12 = vpack.c.bf16 %v643_v10, %v642_v9  ;;  %v1048_v13 = vpop.f32.mrb[12].mxu1 }
 0x1e6   : > { %v628_v14 = vadd.f32 %v1048_v13, %v935_v34  ;;  %v619_v15 = vpop.f32.mrb[13].mxu1 }
 0x1e7   : > { %v620_v16 = vadd.f32 %v935_v34, %v619_v15  ;;  %v1049_v17 = vpop.f32.mrb[14].mxu1  ;;  %1074 = vmatprep.mubr.bf16.mxu0 %v654_v12 }
 0x1e8   : > { %v631_v18 = vadd.f32 %v1049_v17, %v935_v34  ;;  %v622_v19 = vpop.f32.mrb[15].mxu1  ;;  %1075 = vmatmul.mubr.bf16.gmra.mrb[24].mxu0 %v655_v11  ;;  %v648_v21 = vmax.f32 %v628_v14, 0.0 }
 0x1e9   : > { %v623_v20 = vadd.f32 %v935_v34, %v622_v19  ;;  %v646_v23 = vmax.f32 %v620_v16, 0.0 }
 0x1ea   : > { %v649_v22 = vmax.f32 %v631_v18, 0.0 }
 0x1eb   : > { %v647_v24 = vmax.f32 %v623_v20, 0.0 }
 0x1ec   : > { %v657_v25 = vpack.c.bf16 %v649_v22, %v648_v21 }
 0x1ed   : > { %v656_v26 = vpack.c.bf16 %v647_v24, %v646_v23 }
 0x1ef   : > { %1078 = vmatprep.mubr.bf16.mxu0 %v656_v26 }
 0x1f0   : > { %1079 = vmatmul.mubr.bf16.gmra.mrb[28].mxu0 %v657_v25 }
 0x2ab   : > { %v1068_v28 = vpop.f32.mrb[16].mxu0 }
 0x2ac   : > { %v772_v29 = vadd.f32 %v1068_v28, %v944_v27  ;;  %v763_v30 = vpop.f32.mrb[17].mxu0 }
 0x2ad   : > { %v764_v31 = vadd.f32 %v944_v27, %v763_v30  ;;  %v1069_v32 = vpop.f32.mrb[18].mxu0 }
 0x2ae   : > { %828 = vst [vmem:[%s1388_s18 + $0x10] sm:$0xff] %v772_v29  ;;  %v775_v33 = vadd.f32 %v1069_v32, %v944_v27  ;;  %v766_v34 = vpop.f32.mrb[19].mxu0 }
 0x2af   : > { %826 = vst [vmem:[%s1388_s18] sm:$0xff] %v764_v31  ;;  %v767_v35 = vadd.f32 %v944_v27, %v766_v34 }
 0x2b0   : > { %829 = vst [vmem:[%s1388_s18 + $0x18] sm:$0xff] %v775_v33 }
 0x2b1   : > { %827 = vst [vmem:[%s1388_s18 + $0x8] sm:$0xff] %v767_v35 }
 0x2b3   : > { %v1072_v36 = vpop.f32.mrb[20].mxu0 }
 0x2b4   : > { %v788_v37 = vadd.f32 %v1072_v36, %v944_v27  ;;  %v779_v38 = vpop.f32.mrb[21].mxu0 }
 0x2b5   : > { %v780_v39 = vadd.f32 %v944_v27, %v779_v38  ;;  %v1073_v40 = vpop.f32.mrb[22].mxu0 }
 0x2b6   : > { %832 = vst [vmem:[%s1388_s18 + $0x30] sm:$0xff] %v788_v37  ;;  %v791_v41 = vadd.f32 %v1073_v40, %v944_v27  ;;  %v782_v42 = vpop.f32.mrb[23].mxu0 }
 0x2b7   : > { %830 = vst [vmem:[%s1388_s18 + $0x20] sm:$0xff] %v780_v39  ;;  %v783_v43 = vadd.f32 %v944_v27, %v782_v42 }
 0x2b8   : > { %833 = vst [vmem:[%s1388_s18 + $0x38] sm:$0xff] %v791_v41 }
 0x2b9   : > { %831 = vst [vmem:[%s1388_s18 + $0x28] sm:$0xff] %v783_v43 }
 0x2bb   : > { %v1076_v44 = vpop.f32.mrb[24].mxu0 }
 0x2bc   : > { %v804_v45 = vadd.f32 %v1076_v44, %v944_v27  ;;  %v795_v46 = vpop.f32.mrb[25].mxu0 }
 0x2bd   : > { %v796_v47 = vadd.f32 %v944_v27, %v795_v46  ;;  %v1077_v48 = vpop.f32.mrb[26].mxu0 }
 0x2be   : > { %836 = vst [vmem:[%s1388_s18 + $0x50] sm:$0xff] %v804_v45  ;;  %v807_v49 = vadd.f32 %v1077_v48, %v944_v27  ;;  %v798_v50 = vpop.f32.mrb[27].mxu0 }
 0x2bf   : > { %834 = vst [vmem:[%s1388_s18 + $0x40] sm:$0xff] %v796_v47  ;;  %v799_v51 = vadd.f32 %v944_v27, %v798_v50 }
 0x2c0   : > { %837 = vst [vmem:[%s1388_s18 + $0x58] sm:$0xff] %v807_v49 }
 0x2c1   : > { %835 = vst [vmem:[%s1388_s18 + $0x48] sm:$0xff] %v799_v51 }
 0x2c3   : > { %v1080_v52 = vpop.f32.mrb[28].mxu0 }
 0x2c4   : > { %v820_v53 = vadd.f32 %v1080_v52, %v944_v27  ;;  %v811_v54 = vpop.f32.mrb[29].mxu0 }
 0x2c5   : > { %v812_v55 = vadd.f32 %v944_v27, %v811_v54  ;;  %v1081_v56 = vpop.f32.mrb[30].mxu0 }
 0x2c6   : > { %840 = vst [vmem:[%s1388_s18 + $0x70] sm:$0xff] %v820_v53  ;;  %v823_v57 = vadd.f32 %v1081_v56, %v944_v27  ;;  %v814_v58 = vpop.f32.mrb[31].mxu0 }
 0x2c7   : > { %838 = vst [vmem:[%s1388_s18 + $0x60] sm:$0xff] %v812_v55  ;;  %v815_v59 = vadd.f32 %v944_v27, %v814_v58 }
 0x2c8   : > { %841 = vst [vmem:[%s1388_s18 + $0x78] sm:$0xff] %v823_v57 }
 0x2c9   : > { %839 = vst [vmem:[%s1388_s18 + $0x68] sm:$0xff] %v815_v59 }
 0x2ca   : > { %1153 = shalt.err (!%p1150_p3)
}
 0x2cb   : > { %s1154_s14 = scalar_lea.hbm %s1408_s29, 2048  ;;  %s1158_s17 = scalar_lea.hbm %s1465_s7, 4096 }
 0x2cc   : > { %p1155_p4 = scmp.ne.s32.totalorder %s1408_s29, %s1154_s14  ;;  %p1159_p9 = scmp.lt.u32.totalorder %s1408_s29, %s1465_s7 }
 0x2cd   : > { %p1160_p10 = scmp.lt.u32.totalorder %s1158_s17, %s1154_s14  ;;  %p1162_p12 = scmp.lt.u32.totalorder %s1154_s14, %s1408_s29 }
 0x2ce   : > { %p1156_p7 = pnand %p1155_p4, %p1285_p5 }
 0x2cf   : > { %p1161_p11 = por %p1160_p10, %p1159_p9 }
 0x2d0   : > { %p1157_p8 = pneg %p1156_p7 }
 0x2d1   : > { %p1163_p13 = por %p1162_p12, %p1161_p11 }
 0x2d3   : > { %p1164_p0 = pnand %p1163_p13, %p1157_p8 }
 0x2d5   : > { %1167 = shalt.err (!%p1164_p0)
}
 0x2d6   : > { %s1205_s21 = smov 128   ;;  %s1206_s22 = smov 8  }
 0x2d7   : > { %1082 = dma.vmem_to_hbm [thread:$0]  (%p1285_p5), %s1410_s20, 2048, %s1408_s29, %s1417_s28, %s1205_s21, %s1205_s21, %s1206_s22  }
 0x2d8 PF: > { %p1088_p1 = scmp.ge.s32.totalorder %s1202_s27, 2  ;;  %s871_s23 = sand.u32 1, %s1190_s24  }
 0x2d9   : > { %s872_s8 = scalar_lea.sflag [#allocation3], %s871_s23 }
 0x2da   : > { %p1085_p2 = pnand %p1088_p1, %p1289_p6 }
 0x2dc   : > { %1185 = dma.done.wait (!%p1085_p2), %s872_s8, 2048  }
 0x2dd   : > { %1187 = vsyncadd (!%p1085_p2), %s872_s8, 4294965248  ;;  %p17_p3 = scmp.ge.s32.totalorder %s1272_s30, 4   ;;  %s1468_s24 = smov %s1194_s25 }
 0x2de   : > { %s1469_s25 = smov %s1198_s26  ;;  %s1470_s26 = smov %s1283_s10 }
 0x2df   : > { %s1471_s27 = smov %s1272_s30  ;;  %19 = sbr.rel (!%p17_p3) target bundleno = 3 (0x3), region = 83 }
 0x2e6   :  { %877 = vsyncpa [#allocation3], 1 }
 0x2e7   :  { %879 = vsyncpa [#allocation3 + $0x1], 1 }

</bundles_post_ra>
